<compile_context>
chip_gen: v7x
topology: tpu7x:2x2x1
jax: 0.10.0
libtpu: 0.0.40
codegen_flags: <defaults>
</compile_context>

<pallas_src>
import math

import jax
import jax.numpy as jnp
from jax import lax
from jax.experimental import pallas as pl
from jax.experimental.pallas import tpu as pltpu


def _round_up(a: int, b: int) -> int:
    return ((a + b - 1) // b) * b


def _weibull_kernel(x_ref, w2_ref, bias_ref, out_ref):
    """Fused two-head (matmul + bias + exp / softplus) for one row-tile.

    x_ref:    (tile_n, H) f32 VMEM
    w2_ref:   (2, H)      f32 VMEM  (row 0 = alpha weights, row 1 = beta weights)
    bias_ref: (2,)        f32 SMEM  (bias[0] = alpha bias, bias[1] = beta bias)
    out_ref:  (2, tile_n) f32 VMEM  (row 0 = alpha, row 1 = beta) -- lane-dense
    """
    x = x_ref[...]                                              # (tile_n, H)

    # (2, H) . (tile_n, H) contracting H -> (2, tile_n); rows are the two heads.
    z = lax.dot_general(
        w2_ref[...], x,
        dimension_numbers=(((1,), (1,)), ((), ())),
        preferred_element_type=jnp.float32,
    )

    a = z[0:1, :] + bias_ref[0]                                 # alpha logits
    b = z[1:2, :] + bias_ref[1]                                 # beta logits

    alpha = jnp.exp(a)
    # Numerically stable softplus with a single exp + log1p on the EUP.
    beta = jnp.maximum(b, 0.0) + jnp.log1p(jnp.exp(-jnp.abs(b)))

    out_ref[...] = jnp.concatenate([alpha, beta], axis=0)       # (2, tile_n)


def weibull_activation(x, wa, ba, wb, bb, *, tile_n=512):
    """x: (..., H) float32. wa/wb: alpha/beta head weights (any shape of size H),
    ba/bb: biases (size 1). Returns (alpha, beta), each shaped (..., 1)."""
    lead_shape = x.shape[:-1]
    H = x.shape[-1]
    x2d = x.reshape(-1, H).astype(jnp.float32)
    N = x2d.shape[0]

    # Fused head parameters.
    w2 = jnp.concatenate(
        [wa.reshape(1, H), wb.reshape(1, H)], axis=0).astype(jnp.float32)   # (2, H)
    bias = jnp.concatenate(
        [ba.reshape(1), bb.reshape(1)], axis=0).astype(jnp.float32)         # (2,)

    # Tile sizing: lane-dense output needs tile_n % 128 == 0.  Cap so the
    # double-buffered x tile stays small even on v7x's 64 MiB VMEM.
    max_tile_by_vmem = max(128, ((8 * 1024 * 1024) // (H * 4)) // 128 * 128)
    tile_n = _round_up(max(128, min(tile_n, max_tile_by_vmem)), 128)
    tile_n = min(tile_n, _round_up(N, 128))

    # Pad rows to a multiple of tile_n (padded rows are sliced away below).
    n_pad = _round_up(N, tile_n)
    if n_pad != N:
        x2d = jnp.pad(x2d, ((0, n_pad - N), (0, 0)))
    grid = (n_pad // tile_n,)

    # Explicit scoped-VMEM budget (tiny working set; generous headroom).
    tile_bytes = tile_n * H * 4 + 2 * tile_n * 4 + 2 * H * 4
    vmem_limit = min(64 * 1024 * 1024, max(16 * 1024 * 1024, 4 * tile_bytes))

    out = pl.pallas_call(
        _weibull_kernel,
        out_shape=jax.ShapeDtypeStruct((2, n_pad), jnp.float32),
        grid_spec=pltpu.PrefetchScalarGridSpec(
            num_scalar_prefetch=0,
            grid=grid,
            in_specs=[
                pl.BlockSpec((tile_n, H), lambda i: (i, 0)),            # x row-tile
                pl.BlockSpec((2, H), lambda i: (0, 0)),                 # fused weights (resident)
                pl.BlockSpec(memory_space=pltpu.MemorySpace.SMEM),      # biases in SMEM
            ],
            out_specs=pl.BlockSpec((2, tile_n), lambda i: (0, i)),      # lane-dense (2, tile_n)
        ),
        compiler_params=pltpu.CompilerParams(
            dimension_semantics=("parallel",),
            vmem_limit_bytes=vmem_limit,
        ),
        cost_estimate=pl.CostEstimate(
            flops=4 * n_pad * H,                 # one (2,H)x(H,tile_n) matmul per row
            transcendentals=3 * n_pad,           # exp (alpha) + exp + log1p (softplus)
            bytes_accessed=n_pad * H * 4 + 2 * n_pad * 4 + 2 * H * 4 + 2 * 4,
        ),
    )(x2d, w2, bias)

    alpha = out[0, :N].reshape(lead_shape + (1,))
    beta = out[1, :N].reshape(lead_shape + (1,))
    return alpha, beta


def init_linear_params(key, in_features, out_features):
    """Deterministic PyTorch-style nn.Linear init: U(-1/sqrt(in), 1/sqrt(in))."""
    kw, kb = jax.random.split(key)
    bound = 1.0 / math.sqrt(in_features)
    w = jax.random.uniform(kw, (out_features, in_features), jnp.float32,
                           minval=-bound, maxval=bound)
    b = jax.random.uniform(kb, (out_features,), jnp.float32,
                           minval=-bound, maxval=bound)
    return w, b


if __name__ == "__main__":
    key = jax.random.PRNGKey(0)
    k_x, k_a, k_b = jax.random.split(key, 3)

    seq, batch, hidden = 8, 2, 32
    x = jax.random.normal(k_x, (seq, batch, hidden), jnp.float32)

    # nn.Linear(hidden, 1) weights for the alpha and beta heads.
    wa_t, ba = init_linear_params(k_a, hidden, 1)   # wa_t: (1, hidden), ba: (1,)
    wb_t, bb = init_linear_params(k_b, hidden, 1)

    alpha, beta = weibull_activation(x, wa_t, ba, wb_t, bb, tile_n=512)
    alpha = jax.block_until_ready(alpha)
    beta = jax.block_until_ready(beta)

    # Reference check in plain JAX.
    ref_a = jnp.exp(x @ wa_t.T + ba)
    ref_b = jax.nn.softplus(x @ wb_t.T + bb)
    assert alpha.shape == (seq, batch, 1) and beta.shape == (seq, batch, 1)
    assert jnp.allclose(alpha, ref_a, atol=1e-5, rtol=1e-5)
    assert jnp.allclose(beta, ref_b, atol=1e-5, rtol=1e-5)

    print("KERNEL_OK")
</pallas_src>

<mosaic_0001>
module attributes {stable_mosaic.version = 11 : i64} {
  func.func @_weibull_kernel(%arg0: i32, %arg1: memref<128x32xf32, #tpu.memory_space<vmem>>, %arg2: memref<2x32xf32, #tpu.memory_space<vmem>>, %arg3: memref<2xf32, #tpu.memory_space<smem>>, %arg4: memref<2x128xf32, #tpu.memory_space<vmem>>) attributes {dimension_semantics = [#tpu.dimension_semantics<parallel>], iteration_bounds = array<i64: 1>, scalar_prefetch = 0 : i64, scratch_operands = 0 : i64, tpu.core_type = #tpu.core_type<tc>, window_params = [{transform_indices = @transform_0, window_bounds = array<i64: 128, 32>}, {pipeline_mode = #tpu.pipeline_mode<synchronous>, transform_indices = @transform_1, window_bounds = array<i64: 2, 32>}, {transform_indices = @transform_2, window_bounds = array<i64: 2>}, {transform_indices = @transform_3, window_bounds = array<i64: 2, 128>}]} {
    %c0 = arith.constant 0 : index
    %c0_0 = arith.constant 0 : index
    %0 = vector.load %arg1[%c0, %c0_0] : memref<128x32xf32, #tpu.memory_space<vmem>>, vector<128x32xf32>
    %c0_1 = arith.constant 0 : index
    %c0_2 = arith.constant 0 : index
    %1 = vector.load %arg2[%c0_1, %c0_2] : memref<2x32xf32, #tpu.memory_space<vmem>>, vector<2x32xf32>
    %cst = arith.constant dense<0.000000e+00> : vector<2x128xf32>
    %2 = tpu.matmul %1, %0, %cst {dimension_numbers = #tpu.dot_dimension_numbers<[1], [1], [0], [0], [0, 0, 1, 0], [], []>} : vector<2x32xf32>, vector<128x32xf32>, vector<2x128xf32> -> vector<2x128xf32>
    %3 = vector.extract_strided_slice %2 {offsets = [0, 0], sizes = [1, 128], strides = [1, 1]} : vector<2x128xf32> to vector<1x128xf32>
    %c0_3 = arith.constant 0 : index
    %4 = memref.load %arg3[%c0_3] : memref<2xf32, #tpu.memory_space<smem>>
    %5 = vector.broadcast %4 : f32 to vector<1x128xf32>
    %6 = arith.addf %3, %5 : vector<1x128xf32>
    %7 = vector.extract_strided_slice %2 {offsets = [1, 0], sizes = [1, 128], strides = [1, 1]} : vector<2x128xf32> to vector<1x128xf32>
    %c1 = arith.constant 1 : index
    %8 = memref.load %arg3[%c1] : memref<2xf32, #tpu.memory_space<smem>>
    %9 = vector.broadcast %8 : f32 to vector<1x128xf32>
    %10 = arith.addf %7, %9 : vector<1x128xf32>
    %11 = math.exp %6 : vector<1x128xf32>
    %cst_4 = arith.constant 0.000000e+00 : f32
    %12 = vector.broadcast %cst_4 : f32 to vector<1x128xf32>
    %13 = arith.maximumf %10, %12 : vector<1x128xf32>
    %14 = math.absf %10 : vector<1x128xf32>
    %cst_5 = arith.constant 0.000000e+00 : f32
    %15 = vector.broadcast %cst_5 : f32 to vector<1x128xf32>
    %16 = arith.subf %15, %14 : vector<1x128xf32>
    %17 = math.exp %16 : vector<1x128xf32>
    %18 = math.log1p %17 : vector<1x128xf32>
    %19 = arith.addf %13, %18 : vector<1x128xf32>
    %20 = tpu.concatenate %11, %19 in 0 : vector<1x128xf32>, vector<1x128xf32> -> vector<2x128xf32>
    %c0_6 = arith.constant 0 : index
    %c0_7 = arith.constant 0 : index
    %21 = vector.load %arg4[%c0_6, %c0_7] : memref<2x128xf32, #tpu.memory_space<vmem>>, vector<2x128xf32>
    tpu.vector_store %arg4[%c0_6, %c0_7], %20 {strides = array<i32>} : memref<2x128xf32, #tpu.memory_space<vmem>>, vector<2x128xf32>,
    return
  }
  func.func @transform_0(%arg0: i32) -> (i32, i32) {
    %c0_i32 = arith.constant 0 : i32
    %c0_i32_0 = arith.constant 0 : i32
    return %arg0, %c0_i32 : i32, i32
  }
  func.func @transform_1(%arg0: i32) -> (i32, i32) {
    %c0_i32 = arith.constant 0 : i32
    %c0_i32_0 = arith.constant 0 : i32
    %c0_i32_1 = arith.constant 0 : i32
    return %c0_i32, %c0_i32_0 : i32, i32
  }
  func.func @transform_2(%arg0: i32) -> i32 {
    %c0_i32 = arith.constant 0 : i32
    %c0_i32_0 = arith.constant 0 : i32
    return %c0_i32 : i32
  }
  func.func @transform_3(%arg0: i32) -> (i32, i32) {
    %c0_i32 = arith.constant 0 : i32
    %c0_i32_0 = arith.constant 0 : i32
    return %c0_i32, %arg0 : i32, i32
  }
}

</mosaic_0001>

<bundles_post_ra>
// kernel: tpu_custom_call.1
= control target key start
LH: loop header
LB: loop body
LE: loop exit
PB: predicated region body
PF: predicated region fallthrough
CT: control target
= control target key end

     0   :  { %8 = vsyncpa [#allocation4], 0  ;;  %s473_s0 = inlined_call_operand.vmem [shape: f32[128,32], index: 0, kind: input, shape index: {}]   ;;  %s474_s1 = inlined_call_operand.vmem [shape: f32[2,32], index: 1, kind: input, shape index: {}]   ;;  %s475_s2 = inlined_call_operand.vmem [shape: f32[2], index: 2, kind: input, shape index: {}]   ;;  %s476_s3 = inlined_call_operand.hbm [shape: f32[2,128], index: 3, kind: output, shape index: {}]  }
   0x1   :  { %9 = vsyncpa [#allocation3], 0  ;;  %s20_s14 = sshll.u32 %s475_s2, 4  ;;  %s21_s14 = int_to_ptr.vmem [resolvable:$true] %s20_s14 }
   0x2   :  { %s321_s15 = scalar_lea.vmem %s21_s14, 16  ;;  %p326_p1 = scmp.lt.s32.totalorder %s21_s14, %s21_s14 }
   0x3   :  { %p322_p0 = scmp.ne.s32.totalorder %s21_s14, %s321_s15  ;;  %p327_p2 = scmp.lt.s32.totalorder %s321_s15, %s321_s15 }
   0x5   :  { %p328_p3 = por %p327_p2, %p326_p1 }
   0x7   :  { %p329_p4 = pnand %p328_p3, %p322_p0 }
   0x9   :  { %332 = shalt.err (!%p329_p4)
}
   0xa   :  { %s359_s16 = smov [#allocation2]  }
   0xb   :  { %23 = dma.vmem_to_smem %s21_s14, 16, %s359_s16, [#allocation4]  }
   0xc   :  { %355 = dma.done.wait [#allocation4], 16  }
   0xd   :  { %356 = vsyncadd [#allocation4], 4294967280 }
   0xe   :  { %27 = sfence }
   0xf   :  { %v28_v0 = vld [vmem:[%s473_s0] sm:$0xff]  ;;  %v29_v1 = vld [vmem:[%s473_s0 + $0x8] sm:$0xff]  ;;  %vm45_vm0 = vcmask 261120   ;;  %v360_v2 = vmov 0.0|0.0   ;;  %vm361_vm2 = vmmov 0   ;;  %v362_v5 = vmov 0.0  }
  0x10   :  { %278 = vmatprep.subr.bf16.mxu0 %v360_v2  ;;  %v279_v3 = vpack.c.bf16 %v29_v1, %v28_v0  ;;  %vm395_vm1 = vmpackc.low %vm45_vm0, %vm45_vm0  ;;  %275 = vmatprep.mubr.msk.f32.mxu0 %vm361_vm2, %v362_v5  ;;  %v30_v6 = vld [vmem:[%s473_s0 + $0x10] sm:$0xff]  ;;  %v31_v7 = vld [vmem:[%s473_s0 + $0x18] sm:$0xff]  ;;  %s225_s22 = sld [smem:[#allocation2 + $0x1]]  ;;  %s167_s23 = sld [smem:[#allocation2]]  ;;  %vm190_vm4 = vcmask 1040384  }
  0x11   :  { %v283_v8 = vpack.c.bf16 %v31_v7, %v30_v6  ;;  %v32_v9 = vld [vmem:[%s473_s0 + $0x20] sm:$0xff]  ;;  %v33_v10 = vld [vmem:[%s473_s0 + $0x28] sm:$0xff]  ;;  %v34_v12 = vld [vmem:[%s473_s0 + $0x30] sm:$0xff] }
  0x12   :  { %281 = vmatpush3.bf16.xpose.msk.msra.mxu0 %vm395_vm1, %v279_v3  ;;  %v287_v11 = vpack.c.bf16 %v33_v10, %v32_v9  ;;  %v35_v13 = vld [vmem:[%s473_s0 + $0x38] sm:$0xff]  ;;  %v36_v15 = vld [vmem:[%s473_s0 + $0x40] sm:$0xff]  ;;  %v37_v16 = vld [vmem:[%s473_s0 + $0x48] sm:$0xff] }
  0x13   :  { %282 = vmatprep.subr.bf16.mxu0 %v360_v2  ;;  %v291_v14 = vpack.c.bf16 %v35_v13, %v34_v12  ;;  %v295_v17 = vpack.c.bf16 %v37_v16, %v36_v15  ;;  %v38_v18 = vld [vmem:[%s473_s0 + $0x50] sm:$0xff]  ;;  %v39_v19 = vld [vmem:[%s473_s0 + $0x58] sm:$0xff]  ;;  %v40_v21 = vld [vmem:[%s473_s0 + $0x60] sm:$0xff] }
  0x14   :  { %v299_v20 = vpack.c.bf16 %v39_v19, %v38_v18  ;;  %v41_v22 = vld [vmem:[%s473_s0 + $0x68] sm:$0xff]  ;;  %v42_v24 = vld [vmem:[%s473_s0 + $0x70] sm:$0xff]  ;;  %v43_v25 = vld [vmem:[%s473_s0 + $0x78] sm:$0xff]  ;;  %s363_s0 = smov [#allocation5]  }
  0x15   :  { %v303_v23 = vpack.c.bf16 %v41_v22, %v40_v21  ;;  %v307_v26 = vpack.c.bf16 %v43_v25, %v42_v24  ;;  %v44_v27 = vld [vmem:[%s474_s1] sm:$0x3]  ;;  %s199_s1 = sshll.u32 %s363_s0, 4  ;;  %s200_s1 = int_to_ptr.vmem [resolvable:$true] %s199_s1 }
  0x16   :  { %v171_v28 = vstv %s225_s22  ;;  %v168_v35 = vstv %s167_s23  ;;  %s333_s24 = scalar_lea.vmem %s200_s1, 32  ;;  %p338_p6 = scmp.lt.s32.totalorder %s200_s1, %s200_s1 }
  0x17   :  { %p334_p5 = scmp.ne.s32.totalorder %s200_s1, %s333_s24  ;;  %p339_p7 = scmp.lt.s32.totalorder %s333_s24, %s333_s24 }
  0x19   :  { %p340_p8 = por %p339_p7, %p338_p6 }
  0x1a   :  { %285 = vmatpush3.bf16.xpose.msk.msra.mxu0 %vm395_vm1, %v283_v8 }
  0x1b   :  { %286 = vmatprep.subr.bf16.mxu0 %v360_v2  ;;  %p341_p9 = pnand %p340_p8, %p334_p5 }
  0x22   :  { %289 = vmatpush3.bf16.xpose.msk.msra.mxu0 %vm395_vm1, %v287_v11 }
  0x23   :  { %290 = vmatprep.subr.bf16.mxu0 %v360_v2 }
  0x2a   :  { %293 = vmatpush3.bf16.xpose.msk.msra.mxu0 %vm395_vm1, %v291_v14 }
  0x2b   :  { %294 = vmatprep.subr.bf16.mxu0 %v360_v2 }
  0x32   :  { %297 = vmatpush3.bf16.xpose.msk.msra.mxu0 %vm395_vm1, %v295_v17 }
  0x33   :  { %298 = vmatprep.subr.bf16.mxu0 %v360_v2 }
  0x3a   :  { %301 = vmatpush3.bf16.xpose.msk.msra.mxu0 %vm395_vm1, %v299_v20 }
  0x3b   :  { %302 = vmatprep.subr.bf16.mxu0 %v360_v2 }
  0x42   :  { %305 = vmatpush3.bf16.xpose.msk.msra.mxu0 %vm395_vm1, %v303_v23 }
  0x43   :  { %306 = vmatprep.subr.bf16.mxu0 %v360_v2 }
  0x4a   :  { %309 = vmatpush3.bf16.xpose.msk.msra.mxu0 %vm395_vm1, %v307_v26 }
  0x51   :  { %276 = vmatmul.mubr.msk.f32.vlgmr.msra.gmra.mrb[0].mxu0 %vm45_vm0, %v44_v27 }
 0x124   :  { %v163_v29 = vpop.f32.mrb[0].mxu0 }
 0x125   :  { %v172_v30 = vadd.f32 %v171_v28, %v163_v29  ;;  %v277_v31 = vpop.f32.mrb[1].mxu0  ;;  %v169_v37 = vadd.f32 %v168_v35, %v163_v29 }
 0x127   :  { %v176_v32 = vand.u32 2147483647, %v172_v30  ;;  %v173_v39 = vmul.f32 1.442695, %v169_v37  ;;  %v175_v46 = vmax.f32 %v172_v30, 0.0 }
 0x129   :  { %v177_v33 = vsub.f32 0.0, %v176_v32 }
 0x12b   :  { %v178_v34 = vmul.f32 1.442695, %v177_v33 }
 0x12d   :  { %315 = vpow2.f32 %v178_v34 }
 0x137   :  { %v316_v36 = vpop.eup %315 }
 0x138   :  { %v180_v38 = vadd.f32 1.0, %v316_v36  ;;  %v183_v40 = vmul.f32 -0.5, %v316_v36  ;;  %v186_v42 = vand.u32 2147483647, %v316_v36 }
 0x13a   :  { %317 = vlog2.f32 %v180_v38  ;;  %v184_v41 = vadd.f32 1.0, %v183_v40  ;;  %vm187_vm3 = vcmp.lt.f32.partialorder %v186_v42, 0.0004427343 }
 0x13b   :  { %319 = vpow2.f32 %v173_v39 }
 0x13c   :  { %v185_v45 = vmul.f32 %v316_v36, %v184_v41 }
 0x144   :  { %v318_v43 = vpop.eup %317 }
 0x145   :  { %v182_v44 = vmul.f32 0.6931472, %v318_v43  ;;  %v320_v49 = vpop.eup %319 }
 0x147   :  { %v188_v47 = vsel %vm187_vm3, %v185_v45, %v182_v44 }
 0x148   :  { %v189_v48 = vadd.f32 %v188_v47, %v175_v46 }
 0x14a   :  { %v191_v50 = vsel %vm190_vm4, %v320_v49, %v189_v48 }
 0x14b   :  { %192 = vst [vmem:[#allocation5] sm:$0x3] %v191_v50 }
 0x14c   :  { %344 = shalt.err (!%p341_p9)
}
 0x14d   :  { %s345_s27 = scalar_lea.hbm %s476_s3, 32 }
 0x14e   :  { %p346_p10 = scmp.ne.s32.totalorder %s476_s3, %s345_s27  ;;  %p349_p11 = scmp.lt.u32.totalorder %s345_s27, %s476_s3 }
 0x150   :  { %p351_p12 = pnand %p349_p11, %p346_p10 }
 0x152   :  { %354 = shalt.err (!%p351_p12)
}
 0x153   :  { %202 = dma.vmem_to_hbm [thread:$0]  %s200_s1, 32, %s476_s3, [#allocation3]  }
 0x154   :  { %357 = dma.done.wait [#allocation3], 32  }
 0x155   :  { %358 = vsyncadd [#allocation3], 4294967264 }
 0x156   :  { %206 = vsyncpa [#allocation3], 1 }
 0x157   :  { %207 = vsyncpa [#allocation4], 1 }

</bundles_post_ra>
